<compile_context>
chip_gen: v5e
topology: v5e:2x2
jax: 0.10.0
libtpu: 0.0.40
codegen_flags: <defaults>
</compile_context>

<pallas_src>
import jax
import jax.numpy as jnp
from jax.experimental import pallas as pl
from jax.experimental.pallas import tpu as pltpu

LANE_WIDTH = 512  # fixed lane width per row-tile (multiple of 128)


def linear_regression_kernel(wb_ref, x_ref, o_ref):
    # wb_ref: SMEM (2,) f32 = [weight, bias]; x_ref/o_ref: (block_rows, LANE_WIDTH) tiles.
    w = wb_ref[0]
    b = wb_ref[1]
    # Degenerate 1x1 Linear: lane-dense FMA on the VPU (no MXU needed).
    # Compute in f32 (v5e has no bf16 VALU), store in the caller's dtype.
    xv = x_ref[...].astype(jnp.float32)
    o_ref[...] = (xv * w + b).astype(o_ref.dtype)


def _pick_block_rows(total_rows, row_align, itemsize, max_block_bytes):
    """Row-tile height: <= max_block_bytes, multiple of row_align, >= 2 blocks when possible."""
    cap = max(row_align,
              (max_block_bytes // (LANE_WIDTH * itemsize)) // row_align * row_align)
    if total_rows <= cap:
        # Fits one block: still split into two (when > one min-tile of rows) so
        # v7x's two TensorCores both stream on the "parallel" grid axis.
        half = pl.cdiv(total_rows, 2)
        return min(cap, max(row_align, pl.cdiv(half, row_align) * row_align))
    return cap


def linear_regression(x, weight, bias, *,
                      max_block_bytes=2 * 1024 * 1024,
                      min_pallas_elems=1 << 16):
    """Forward of nn.Linear(1, 1): x (N, 1) -> (N, 1), out = x @ W^T + b."""
    n = x.shape[0]
    dtype = x.dtype
    w = weight.reshape(()).astype(jnp.float32)
    b = bias.reshape(()).astype(jnp.float32)

    # Small-N fast path: a single fused XLA FMA beats any kernel dispatch here.
    if n < min_pallas_elems:
        return (x.astype(jnp.float32) * w + b).astype(dtype)

    itemsize = jnp.dtype(dtype).itemsize
    row_align = 8 if itemsize >= 4 else 16   # f32 min tile (8,128); bf16/fp16 (16,128)
    pad_quantum = row_align * LANE_WIDTH     # one row-tile of elements

    flat = x.reshape(-1)
    padded_n = pl.cdiv(n, pad_quantum) * pad_quantum
    if padded_n != n:
        # < one row-tile of pad; skipped entirely when N is already tile-aligned.
        flat = jnp.pad(flat, (0, padded_n - n))
    total_rows = padded_n // LANE_WIDTH
    x2d = flat.reshape(total_rows, LANE_WIDTH)

    block_rows = _pick_block_rows(total_rows, row_align, itemsize, max_block_bytes)
    num_blocks = pl.cdiv(total_rows, block_rows)

    # [w, b] packed into one tiny f32 SMEM operand, read once per grid step.
    wb = jnp.stack([w, b])

    block_bytes = block_rows * LANE_WIDTH * itemsize
    # Double-buffered in + out is ~4 * block_bytes; leave headroom, stay well
    # under v7x's 64 MiB physical VMEM (and v5e's 16 MiB scoped default).
    vmem_limit = int(min(32 * 1024 * 1024, max(8 * 1024 * 1024, 6 * block_bytes)))

    out2d = pl.pallas_call(
        linear_regression_kernel,
        out_shape=jax.ShapeDtypeStruct((total_rows, LANE_WIDTH), dtype),
        grid=(num_blocks,),
        in_specs=[
            pl.BlockSpec(memory_space=pltpu.SMEM),                      # [w, b] scalars
            pl.BlockSpec((block_rows, LANE_WIDTH), lambda i: (i, 0)),   # contiguous row tile
        ],
        out_specs=pl.BlockSpec((block_rows, LANE_WIDTH), lambda i: (i, 0)),
        compiler_params=pltpu.CompilerParams(
            dimension_semantics=("parallel",),
            vmem_limit_bytes=vmem_limit,
        ),
    )(wb, x2d)

    out_flat = out2d.reshape(-1)
    if padded_n != n:
        out_flat = out_flat[:n]          # only pays a slice when padding was needed
    return out_flat.reshape(n, 1)


if __name__ == "__main__":
    key = jax.random.PRNGKey(0)
    kx, kw, kb, kx2, kx3 = jax.random.split(key, 5)

    # 10 samples in [-10, 10], sorted — mirrors the original script's synthetic data.
    x = jnp.sort(
        jax.random.uniform(kx, (10,), minval=-10.0, maxval=10.0)).reshape(10, 1)

    # PyTorch Linear(1, 1) init: uniform(-1/sqrt(fan_in), 1/sqrt(fan_in)) with fan_in = 1.
    weight = jax.random.uniform(kw, (1, 1), minval=-1.0, maxval=1.0)
    bias = jax.random.uniform(kb, (1,), minval=-1.0, maxval=1.0)

    # Small-N path (fused XLA FMA short circuit).
    out = jax.block_until_ready(linear_regression(x, weight, bias))
    ref = x @ weight.T + bias
    assert out.shape == (10, 1) and out.dtype == x.dtype
    assert jnp.allclose(out, ref, atol=1e-5, rtol=1e-5), "mismatch vs reference (N=10)"

    # Pallas path, padded / single-block case (N not a multiple of one row-tile).
    xb = jax.random.uniform(kx2, (3000, 1), minval=-10.0, maxval=10.0)
    outb = jax.block_until_ready(
        linear_regression(xb, weight, bias, min_pallas_elems=0))
    refb = xb @ weight.T + bias
    assert outb.shape == (3000, 1)
    assert jnp.allclose(outb, refb, atol=1e-5, rtol=1e-5), "mismatch vs reference (N=3000)"

    # Pallas path, copy-free (tile-aligned) multi-block case -> 2 parallel grid blocks.
    xc = jax.random.uniform(kx3, (8192, 1), minval=-10.0, maxval=10.0)
    outc = jax.block_until_ready(
        linear_regression(xc, weight, bias, min_pallas_elems=0))
    refc = xc @ weight.T + bias
    assert outc.shape == (8192, 1)
    assert jnp.allclose(outc, refc, atol=1e-5, rtol=1e-5), "mismatch vs reference (N=8192)"

    print("KERNEL_OK")
</pallas_src>

<mosaic_0001>
module attributes {stable_mosaic.version = 11 : i64} {
  func.func @linear_regression_kernel(%arg0: i32, %arg1: memref<2xf32, #tpu.memory_space<smem>>, %arg2: memref<8x512xf32, #tpu.memory_space<vmem>>, %arg3: memref<8x512xf32, #tpu.memory_space<vmem>>) attributes {dimension_semantics = [#tpu.dimension_semantics<parallel>], iteration_bounds = array<i64: 1>, scalar_prefetch = 0 : i64, scratch_operands = 0 : i64, tpu.core_type = #tpu.core_type<tc>, window_params = [{transform_indices = @transform_0, window_bounds = array<i64: 2>}, {transform_indices = @transform_1, window_bounds = array<i64: 8, 512>}, {transform_indices = @transform_2, window_bounds = array<i64: 8, 512>}]} {
    %c0 = arith.constant 0 : index
    %0 = memref.load %arg1[%c0] : memref<2xf32, #tpu.memory_space<smem>>
    %c1 = arith.constant 1 : index
    %1 = memref.load %arg1[%c1] : memref<2xf32, #tpu.memory_space<smem>>
    %c0_0 = arith.constant 0 : index
    %c0_1 = arith.constant 0 : index
    %2 = vector.load %arg2[%c0_0, %c0_1] : memref<8x512xf32, #tpu.memory_space<vmem>>, vector<8x512xf32>
    %3 = vector.broadcast %0 : f32 to vector<8x512xf32>
    %4 = arith.mulf %2, %3 : vector<8x512xf32>
    %5 = vector.broadcast %1 : f32 to vector<8x512xf32>
    %6 = arith.addf %4, %5 : vector<8x512xf32>
    %c0_2 = arith.constant 0 : index
    %c0_3 = arith.constant 0 : index
    %7 = vector.load %arg3[%c0_2, %c0_3] : memref<8x512xf32, #tpu.memory_space<vmem>>, vector<8x512xf32>
    tpu.vector_store %arg3[%c0_2, %c0_3], %6 {strides = array<i32>} : memref<8x512xf32, #tpu.memory_space<vmem>>, vector<8x512xf32>,
    return
  }
  func.func @transform_0(%arg0: i32) -> i32 {
    %c0_i32 = arith.constant 0 : i32
    %c0_i32_0 = arith.constant 0 : i32
    return %c0_i32 : i32
  }
  func.func @transform_1(%arg0: i32) -> (i32, i32) {
    %c0_i32 = arith.constant 0 : i32
    %c0_i32_0 = arith.constant 0 : i32
    return %arg0, %c0_i32 : i32, i32
  }
  func.func @transform_2(%arg0: i32) -> (i32, i32) {
    %c0_i32 = arith.constant 0 : i32
    %c0_i32_0 = arith.constant 0 : i32
    return %arg0, %c0_i32 : i32, i32
  }
}

</mosaic_0001>

<bundles_post_ra>
// kernel: tpu_custom_call.1
= control target key start
LH: loop header
LB: loop body
LE: loop exit
PB: predicated region body
PF: predicated region fallthrough
CT: control target
= control target key end

     0   :  { %7 = vsyncpa [#allocation5], 0  ;;  %s174_s0 = inlined_call_operand.hbm [shape: f32[2], index: 0, kind: input, shape index: {}]   ;;  %s175_s1 = inlined_call_operand.hbm [shape: f32[8,512], index: 1, kind: input, shape index: {}]   ;;  %s176_s2 = inlined_call_operand.hbm [shape: f32[8,512], index: 2, kind: output, shape index: {}]  }
   0x1   :  { %8 = vsyncpa [#allocation3], 0 }
   0x2   :  { %9 = vsyncpa [#allocation4], 0  ;;  %s15_s11 = sshll.u32 %s174_s0, 4  ;;  %s24_s14 = sshll.u32 %s175_s1, 4  ;;  %s16_s11 = int_to_ptr.hbm [resolvable:$true] %s15_s11  ;;  %s25_s14 = int_to_ptr.hbm [resolvable:$true] %s24_s14 }
   0x3   :  { %s147_s15 = smov [#allocation2]   ;;  %s148_s16 = smov [#allocation6]  }
   0x4   :  { %18 = dma.hbm_to_smem %s16_s11, 16, %s147_s15, [#allocation5]  }
   0x5   :  { %s26_s17 = sshll.u32 %s148_s16, 4  ;;  %s27_s17 = int_to_ptr.vmem [resolvable:$true] %s26_s17 }
   0x6   :  { %29 = dma.hbm_to_vmem [thread:$0]  %s25_s14, 512, %s27_s17, [#allocation3]  }
   0x7   :  { %141 = dma.done.wait [#allocation5], 16  }
   0x8   :  { %142 = vsyncadd [#allocation5], 4294967280 }
   0x9   :  { %143 = dma.done.wait [#allocation3], 512  }
   0xa   :  { %144 = vsyncadd [#allocation3], 4294966784 }
   0xb   :  { %38 = sfence }
   0xc   :  { %s39_s18 = sld [smem:[#allocation2]]  ;;  %v41_v0 = vld [vmem:[#allocation6] sm:$0xff]  ;;  %v42_v1 = vld [vmem:[#allocation6 + $0x8] sm:$0xff]  ;;  %v43_v2 = vld [vmem:[#allocation6 + $0x10] sm:$0xff]  ;;  %s149_s0 = smov [#allocation7]  }
   0xd   :  { %s77_s19 = sld [smem:[#allocation2 + $0x1]]  ;;  %v44_v3 = vld [vmem:[#allocation6 + $0x18] sm:$0xff]  ;;  %s64_s1 = sshll.u32 %s149_s0, 4  ;;  %s65_s1 = int_to_ptr.vmem [resolvable:$true] %s64_s1 }
   0xe   :  { %s66_s22 = sshll.u32 %s176_s2, 4  ;;  %s67_s22 = int_to_ptr.hbm [resolvable:$true] %s66_s22 }
  0x12   :  { %v45_v4 = vstv %s39_s18 }
  0x13   :  { %v46_v5 = vmul.f32 %v45_v4, %v41_v0  ;;  %v50_v6 = vstv %s77_s19  ;;  %v47_v7 = vmul.f32 %v45_v4, %v42_v1  ;;  %v48_v8 = vmul.f32 %v45_v4, %v43_v2 }
  0x14   :  { %v49_v9 = vmul.f32 %v45_v4, %v44_v3 }
  0x15   :  { %v51_v10 = vadd.f32 %v50_v6, %v46_v5  ;;  %v52_v11 = vadd.f32 %v50_v6, %v47_v7  ;;  %v53_v12 = vadd.f32 %v50_v6, %v48_v8 }
  0x16   :  { %v54_v13 = vadd.f32 %v50_v6, %v49_v9 }
  0x17   :  { %55 = vst [vmem:[#allocation7] sm:$0xff] %v51_v10 }
  0x18   :  { %56 = vst [vmem:[#allocation7 + $0x8] sm:$0xff] %v52_v11 }
  0x19   :  { %57 = vst [vmem:[#allocation7 + $0x10] sm:$0xff] %v53_v12 }
  0x1a   :  { %58 = vst [vmem:[#allocation7 + $0x18] sm:$0xff] %v54_v13 }
  0x1b   :  { %69 = dma.vmem_to_hbm [thread:$0]  %s65_s1, 512, %s67_s22, [#allocation4]  }
  0x1c   :  { %145 = dma.done.wait [#allocation4], 512  }
  0x1d   :  { %146 = vsyncadd [#allocation4], 4294966784 }
  0x1e   :  { %74 = vsyncpa [#allocation3], 1 }
  0x1f   :  { %75 = vsyncpa [#allocation4], 1 }
  0x20   :  { %76 = vsyncpa [#allocation5], 1 }

</bundles_post_ra>
